<compile_context>
chip_gen: v5e
topology: v5e:2x2
jax: 0.10.0
libtpu: 0.0.40
codegen_flags: <defaults>
</compile_context>

<pallas_src>
import functools

import jax
import jax.numpy as jnp
from jax.experimental import pallas as pl
from jax.experimental.pallas import tpu as pltpu


def _round_up(n, m):
    return ((n + m - 1) // m) * m


def _critic_kernel(x_ref, w1_ref, b1_ref, w2_ref, b2_ref, w3_ref, b3_ref, o_ref):
    # Layer 1: (TB, Dp) @ (Dp, 256) on the MXU; bf16 cast happens in-kernel
    # (free VPU filler under the MXU, saves a wrapper-side pass over x).
    xb = x_ref[...].astype(jnp.bfloat16)
    h1 = jnp.dot(xb, w1_ref[...], preferred_element_type=jnp.float32)
    # Fused bias + ReLU + bf16 cast: only the bf16 h1 is materialized for layer 2.
    h1b = jnp.maximum(h1 + b1_ref[...], 0.0).astype(jnp.bfloat16)

    # Layer 2: (TB, 256) @ (256, 128) on the MXU, f32 accumulation / bias / ReLU.
    h2 = jnp.dot(h1b, w2_ref[...], preferred_element_type=jnp.float32)
    h2 = jnp.maximum(h2 + b2_ref[...], 0.0)                       # (TB, 128) f32

    # Output head (K=128, N=1): transpose h2 on the (idle) XLU and do a skinny
    # f32 matmul so the TB head values land lane-dense -> one (1, TB) slab store
    # instead of TB/8 lane-masked column stores.
    v = jnp.dot(w3_ref[...], h2.T, preferred_element_type=jnp.float32)   # (1, TB)
    v = v + b3_ref[...]
    o_ref[...] = v[None].astype(o_ref.dtype)                      # (1, 1, TB)
    # TODO(synk): if h1/h2 vst pressure shows up in bundle dumps, split TB into
    # fori_loop sub-tiles so the pointwise chains stay closer to vregs.


@functools.partial(jax.jit, static_argnames=("block_b",))
def critic_forward(x, params, *, block_b=4096):
    """x: (B, state_dim) float32. params: dict from init_params (kernel layout)."""
    w1, b1 = params["w1"], params["b1"]
    w2, b2 = params["w2"], params["b2"]
    w3, b3 = params["w3"], params["b3"]

    B = x.shape[0]
    Dp, H1 = w1.shape          # Dp = state_dim rounded up to a multiple of 8
    H2 = w2.shape[1]

    # Feature pad only when state_dim is not already a multiple of 8 (no-op in
    # the common case); x stays f32 — the bf16 cast is done inside the kernel.
    if x.shape[1] != Dp:
        x = jnp.pad(x, ((0, 0), (0, Dp - x.shape[1])))

    # Batch tile (multiple of 128 so the lane-dense output slab tiles cleanly):
    #  * aim for >= ~8 grid steps when B is large (v7x megacore, pipeline depth),
    #  * never below 512 rows (amortize per-step overhead) unless B itself is tiny,
    #  * keep the double-buffered f32 x tile under ~8 MiB of VMEM.
    steps_cap = _round_up(max(-(-B // 8), 512), 128)
    vmem_cap = max(128, (8 * 1024 * 1024) // (Dp * 4 * 2) // 128 * 128)
    TB = max(128, min(block_b, _round_up(B, 128), steps_cap, vmem_cap))
    Bp = _round_up(B, TB)
    if Bp != B:
        # TODO(synk): could avoid this copy with a cdiv grid + discarded last tile.
        x = jnp.pad(x, ((0, Bp - B), (0, 0)))
    G = Bp // TB

    # Weights/biases: constant index_map -> resident in VMEM across grid steps.
    # TODO(synk): could add pipeline_mode=pl.Buffered(1) to drop their second
    # VMEM buffer (~160 KiB); left at default for lowering safety.
    resident = lambda a: pl.BlockSpec(a.shape, lambda i: (0,) * a.ndim)

    flops = 2 * Bp * (Dp * H1 + H1 * H2 + H2)
    bytes_accessed = (
        x.size * x.dtype.itemsize
        + sum(int(p.size) * p.dtype.itemsize for p in (w1, b1, w2, b2, w3, b3))
        + Bp * 4
    )

    out = pl.pallas_call(
        _critic_kernel,
        out_shape=jax.ShapeDtypeStruct((G, 1, TB), jnp.float32),
        grid_spec=pltpu.PrefetchScalarGridSpec(
            num_scalar_prefetch=0,
            grid=(G,),
            in_specs=[
                pl.BlockSpec((TB, Dp), lambda i: (i, 0)),   # x: streamed per tile
                resident(w1), resident(b1),
                resident(w2), resident(b2),
                resident(w3), resident(b3),
            ],
            out_specs=pl.BlockSpec((1, 1, TB), lambda i: (i, 0, 0)),
        ),
        compiler_params=pltpu.CompilerParams(
            dimension_semantics=("parallel",),          # megacore sharding on v7x
            vmem_limit_bytes=32 * 1024 * 1024,          # safe on v5e/v6e/v7x
        ),
        cost_estimate=pl.CostEstimate(
            flops=flops, transcendentals=0, bytes_accessed=bytes_accessed),
    )(x, w1, b1, w2, b2, w3, b3)

    out = out.reshape(Bp, 1)
    return out[:B] if Bp != B else out


def init_params(key, state_dim, hidden_layers=(256, 128)):
    """PyTorch nn.Linear-style init (U[-1/sqrt(fan_in), +]), stored in kernel layout."""
    dims = [state_dim] + list(hidden_layers) + [1]
    params = {}
    for i in range(len(dims) - 1):
        fan_in, fan_out = dims[i], dims[i + 1]
        key, kw, kb = jax.random.split(key, 3)
        bound = 1.0 / jnp.sqrt(fan_in)
        # stored as (in, out): the transpose of PyTorch's (out, in)
        params[f"w{i+1}"] = jax.random.uniform(
            kw, (fan_in, fan_out), jnp.float32, -bound, bound)
        params[f"b{i+1}"] = jax.random.uniform(
            kb, (1, fan_out), jnp.float32, -bound, bound)

    # Kernel layout adjustments:
    #  * zero-pad w1 rows so the layer-1 K dim is a multiple of 8 (NOT 128 —
    #    padding K to 128 only adds x DMA traffic with no MXU benefit),
    #  * MXU weights (w1, w2) stored in bf16 (f32 accumulation in-kernel),
    #  * N=1 head stored as a (1, H2) f32 row for the transposed head matmul.
    Dp = _round_up(state_dim, 8)
    if Dp != state_dim:
        params["w1"] = jnp.pad(params["w1"], ((0, Dp - state_dim), (0, 0)))
    params["w1"] = params["w1"].astype(jnp.bfloat16)
    params["w2"] = params["w2"].astype(jnp.bfloat16)
    params["w3"] = params["w3"].T          # (1, 128), stays f32
    return params


def critic_reference(x, params):
    """Pure-JAX reference with the same numerics as the kernel (bf16 dots)."""
    Dp = params["w1"].shape[0]
    xb = x.astype(jnp.bfloat16)
    if xb.shape[1] != Dp:
        xb = jnp.pad(xb, ((0, 0), (0, Dp - xb.shape[1])))
    h1 = jnp.dot(xb, params["w1"], preferred_element_type=jnp.float32)
    h1 = jnp.maximum(h1 + params["b1"], 0.0)
    h2 = jnp.dot(h1.astype(jnp.bfloat16), params["w2"],
                 preferred_element_type=jnp.float32)
    h2 = jnp.maximum(h2 + params["b2"], 0.0)
    return jnp.sum(h2 * params["w3"], axis=-1, keepdims=True) + params["b3"]


def critic_reference_f32(x, params):
    """All-f32 reference (PyTorch semantics) for a loose sanity check on bf16 drift."""
    Dp = params["w1"].shape[0]
    xp = x
    if xp.shape[1] != Dp:
        xp = jnp.pad(xp, ((0, 0), (0, Dp - xp.shape[1])))
    h1 = jnp.maximum(xp @ params["w1"].astype(jnp.float32) + params["b1"], 0.0)
    h2 = jnp.maximum(h1 @ params["w2"].astype(jnp.float32) + params["b2"], 0.0)
    return jnp.sum(h2 * params["w3"], axis=-1, keepdims=True) + params["b3"]


if __name__ == "__main__":
    key = jax.random.PRNGKey(0)
    k_x, k_p = jax.random.split(key)

    batch, state_dim = 8, 32
    x = jax.random.normal(k_x, (batch, state_dim), jnp.float32)
    params = init_params(k_p, state_dim, hidden_layers=(256, 128))

    out = jax.block_until_ready(critic_forward(x, params))
    ref = critic_reference(x, params)
    ref32 = critic_reference_f32(x, params)

    assert out.shape == (batch, 1), out.shape
    # Tight check against the bf16-matched reference.
    assert jnp.allclose(out, ref, atol=2e-3, rtol=2e-3), \
        f"max err vs bf16 ref {jnp.max(jnp.abs(out - ref))}"
    # Loose sanity check against the all-f32 (PyTorch-semantics) path.
    assert jnp.allclose(out, ref32, atol=5e-2, rtol=5e-2), \
        f"max err vs f32 ref {jnp.max(jnp.abs(out - ref32))}"
    print("KERNEL_OK")
</pallas_src>

<mosaic_0001>
module attributes {stable_mosaic.version = 11 : i64} {
  func.func @_critic_kernel(%arg0: i32, %arg1: memref<128x32xf32, #tpu.memory_space<vmem>>, %arg2: memref<32x256xbf16, #tpu.memory_space<vmem>>, %arg3: memref<1x256xf32, #tpu.memory_space<vmem>>, %arg4: memref<256x128xbf16, #tpu.memory_space<vmem>>, %arg5: memref<1x128xf32, #tpu.memory_space<vmem>>, %arg6: memref<1x128xf32, #tpu.memory_space<vmem>>, %arg7: memref<1x1xf32, #tpu.memory_space<vmem>>, %arg8: memref<1x1x128xf32, #tpu.memory_space<vmem>>) attributes {dimension_semantics = [#tpu.dimension_semantics<parallel>], iteration_bounds = array<i64: 1>, scalar_prefetch = 0 : i64, scratch_operands = 0 : i64, tpu.core_type = #tpu.core_type<tc>, window_params = [{transform_indices = @transform_0, window_bounds = array<i64: 128, 32>}, {pipeline_mode = #tpu.pipeline_mode<synchronous>, transform_indices = @transform_1, window_bounds = array<i64: 32, 256>}, {pipeline_mode = #tpu.pipeline_mode<synchronous>, transform_indices = @transform_2, window_bounds = array<i64: 1, 256>}, {pipeline_mode = #tpu.pipeline_mode<synchronous>, transform_indices = @transform_3, window_bounds = array<i64: 256, 128>}, {pipeline_mode = #tpu.pipeline_mode<synchronous>, transform_indices = @transform_4, window_bounds = array<i64: 1, 128>}, {pipeline_mode = #tpu.pipeline_mode<synchronous>, transform_indices = @transform_5, window_bounds = array<i64: 1, 128>}, {pipeline_mode = #tpu.pipeline_mode<synchronous>, transform_indices = @transform_6, window_bounds = array<i64: 1, 1>}, {transform_indices = @transform_7, window_bounds = array<i64: 1, 1, 128>}]} {
    %c0 = arith.constant 0 : index
    %c0_0 = arith.constant 0 : index
    %0 = vector.load %arg1[%c0, %c0_0] : memref<128x32xf32, #tpu.memory_space<vmem>>, vector<128x32xf32>
    %1 = arith.truncf %0 : vector<128x32xf32> to vector<128x32xbf16>
    %c0_1 = arith.constant 0 : index
    %c0_2 = arith.constant 0 : index
    %2 = vector.load %arg2[%c0_1, %c0_2] : memref<32x256xbf16, #tpu.memory_space<vmem>>, vector<32x256xbf16>
    %cst = arith.constant dense<0.000000e+00> : vector<128x256xf32>
    %3 = tpu.matmul %1, %2, %cst {dimension_numbers = #tpu.dot_dimension_numbers<[1], [0], [0], [1], [0, 0, 1, 1], [], []>} : vector<128x32xbf16>, vector<32x256xbf16>, vector<128x256xf32> -> vector<128x256xf32>
    %c0_3 = arith.constant 0 : index
    %c0_4 = arith.constant 0 : index
    %4 = vector.load %arg3[%c0_3, %c0_4] : memref<1x256xf32, #tpu.memory_space<vmem>>, vector<1x256xf32>
    %5 = vector.broadcast %4 : vector<1x256xf32> to vector<128x256xf32>
    %6 = arith.addf %3, %5 : vector<128x256xf32>
    %cst_5 = arith.constant 0.000000e+00 : f32
    %7 = vector.broadcast %cst_5 : f32 to vector<128x256xf32>
    %8 = arith.maximumf %6, %7 : vector<128x256xf32>
    %9 = arith.truncf %8 : vector<128x256xf32> to vector<128x256xbf16>
    %c0_6 = arith.constant 0 : index
    %c0_7 = arith.constant 0 : index
    %10 = vector.load %arg4[%c0_6, %c0_7] : memref<256x128xbf16, #tpu.memory_space<vmem>>, vector<256x128xbf16>
    %cst_8 = arith.constant dense<0.000000e+00> : vector<128x128xf32>
    %11 = tpu.matmul %9, %10, %cst_8 {dimension_numbers = #tpu.dot_dimension_numbers<[1], [0], [0], [1], [0, 0, 1, 1], [], []>} : vector<128x256xbf16>, vector<256x128xbf16>, vector<128x128xf32> -> vector<128x128xf32>
    %c0_9 = arith.constant 0 : index
    %c0_10 = arith.constant 0 : index
    %12 = vector.load %arg5[%c0_9, %c0_10] : memref<1x128xf32, #tpu.memory_space<vmem>>, vector<1x128xf32>
    %13 = vector.broadcast %12 : vector<1x128xf32> to vector<128x128xf32>
    %14 = arith.addf %11, %13 : vector<128x128xf32>
    %cst_11 = arith.constant 0.000000e+00 : f32
    %15 = vector.broadcast %cst_11 : f32 to vector<128x128xf32>
    %16 = arith.maximumf %14, %15 : vector<128x128xf32>
    %c0_12 = arith.constant 0 : index
    %c0_13 = arith.constant 0 : index
    %17 = vector.load %arg6[%c0_12, %c0_13] : memref<1x128xf32, #tpu.memory_space<vmem>>, vector<1x128xf32>
    %18 = tpu.transpose %16, [1, 0] : vector<128x128xf32> -> vector<128x128xf32>
    %cst_14 = arith.constant dense<0.000000e+00> : vector<1x128xf32>
    %19 = tpu.matmul %17, %18, %cst_14 {dimension_numbers = #tpu.dot_dimension_numbers<[1], [0], [0], [1], [0, 0, 1, 1], [], []>} : vector<1x128xf32>, vector<128x128xf32>, vector<1x128xf32> -> vector<1x128xf32>
    %c0_15 = arith.constant 0 : index
    %c0_16 = arith.constant 0 : index
    %20 = vector.load %arg7[%c0_15, %c0_16] : memref<1x1xf32, #tpu.memory_space<vmem>>, vector<1x1xf32>
    %21 = vector.broadcast %20 : vector<1x1xf32> to vector<1x128xf32>
    %22 = arith.addf %19, %21 : vector<1x128xf32>
    %23 = vector.shape_cast %22 : vector<1x128xf32> to vector<1x1x128xf32>
    %c0_17 = arith.constant 0 : index
    %c0_18 = arith.constant 0 : index
    %c0_19 = arith.constant 0 : index
    %24 = vector.load %arg8[%c0_17, %c0_18, %c0_19] : memref<1x1x128xf32, #tpu.memory_space<vmem>>, vector<1x1x128xf32>
    tpu.vector_store %arg8[%c0_17, %c0_18, %c0_19], %23 {strides = array<i32>} : memref<1x1x128xf32, #tpu.memory_space<vmem>>, vector<1x1x128xf32>,
    return
  }
  func.func @transform_0(%arg0: i32) -> (i32, i32) {
    %c0_i32 = arith.constant 0 : i32
    %c0_i32_0 = arith.constant 0 : i32
    return %arg0, %c0_i32 : i32, i32
  }
  func.func @transform_1(%arg0: i32) -> (i32, i32) {
    %c0_i32 = arith.constant 0 : i32
    %c0_i32_0 = arith.constant 0 : i32
    %c0_i32_1 = arith.constant 0 : i32
    return %c0_i32, %c0_i32_0 : i32, i32
  }
  func.func @transform_2(%arg0: i32) -> (i32, i32) {
    %c0_i32 = arith.constant 0 : i32
    %c0_i32_0 = arith.constant 0 : i32
    %c0_i32_1 = arith.constant 0 : i32
    return %c0_i32, %c0_i32_0 : i32, i32
  }
  func.func @transform_3(%arg0: i32) -> (i32, i32) {
    %c0_i32 = arith.constant 0 : i32
    %c0_i32_0 = arith.constant 0 : i32
    %c0_i32_1 = arith.constant 0 : i32
    return %c0_i32, %c0_i32_0 : i32, i32
  }
  func.func @transform_4(%arg0: i32) -> (i32, i32) {
    %c0_i32 = arith.constant 0 : i32
    %c0_i32_0 = arith.constant 0 : i32
    %c0_i32_1 = arith.constant 0 : i32
    return %c0_i32, %c0_i32_0 : i32, i32
  }
  func.func @transform_5(%arg0: i32) -> (i32, i32) {
    %c0_i32 = arith.constant 0 : i32
    %c0_i32_0 = arith.constant 0 : i32
    %c0_i32_1 = arith.constant 0 : i32
    return %c0_i32, %c0_i32_0 : i32, i32
  }
  func.func @transform_6(%arg0: i32) -> (i32, i32) {
    %c0_i32 = arith.constant 0 : i32
    %c0_i32_0 = arith.constant 0 : i32
    %c0_i32_1 = arith.constant 0 : i32
    return %c0_i32, %c0_i32_0 : i32, i32
  }
  func.func @transform_7(%arg0: i32) -> (i32, i32, i32) {
    %c0_i32 = arith.constant 0 : i32
    %c0_i32_0 = arith.constant 0 : i32
    %c0_i32_1 = arith.constant 0 : i32
    return %arg0, %c0_i32, %c0_i32_0 : i32, i32, i32
  }
}

</mosaic_0001>

<bundles_post_ra>
// kernel: critic_forward.1
= control target key start
LH: loop header
LB: loop body
LE: loop exit
PB: predicated region body
PF: predicated region fallthrough
CT: control target
= control target key end

     0   :  { %s944_s0 = inlined_call_operand.vmem [shape: f32[128,32], index: 0, kind: input, shape index: {}]   ;;  %s945_s1 = inlined_call_operand.hbm [shape: bf16[32,256], index: 1, kind: input, shape index: {}]   ;;  %s946_s2 = inlined_call_operand.vmem [shape: f32[1,256], index: 2, kind: input, shape index: {}]   ;;  %s947_s3 = inlined_call_operand.vmem [shape: bf16[256,128], index: 3, kind: input, shape index: {}]   ;;  %s948_s4 = inlined_call_operand.vmem [shape: f32[1,128], index: 4, kind: input, shape index: {}]   ;;  %s949_s5 = inlined_call_operand.vmem [shape: f32[1,128], index: 5, kind: input, shape index: {}]   ;;  %s950_s6 = inlined_call_operand.<no memory space> [shape: f32[1,1], index: 6, kind: input, shape index: {}]   ;;  %s951_s7 = inlined_call_operand.vmem [shape: f32[1,1,128], index: 7, kind: output, shape index: {}]  }
   0x1   :  { %v12_v0 = vstv %s950_s6 }
   0x2   :  { %13 = vst [vmem:[#allocation2] sm:$0x1] %v12_v0 }
   0x3   :  { %14 = vsyncpa [#allocation4], 0  ;;  %s21_s28 = sshll.u32 %s945_s1, 4  ;;  %s698_s29 = smov [#allocation3]   ;;  %s22_s28 = int_to_ptr.hbm [resolvable:$true] %s21_s28 }
   0x4   :  { %s23_s30 = sshll.u32 %s698_s29, 4  ;;  %s699_s8 = smov 128   ;;  %s24_s30 = int_to_ptr.vmem [resolvable:$true] %s23_s30 }
   0x5   :  { %s700_s9 = smov 8  }
   0x6   :  { %29 = dma.hbm_to_vmem [thread:$0]  %s22_s28, 512, %s24_s30, [#allocation4], %s699_s8, %s699_s8, %s700_s9  }
   0x7   :  { %696 = dma.done.wait [#allocation4], 512  }
   0x8   :  { %697 = vsyncadd [#allocation4], 4294966784  ;;  %v560_v1 = vld [vmem:[#allocation3 + $0x10] sm:$0xf]  ;;  %v649_v2 = vld [vmem:[#allocation3 + $0x14] sm:$0xf0] }
   0x9   :  { %v648_v3 = vld [vmem:[#allocation3 + $0x14] sm:$0xf]  ;;  %v561_v4 = vor.u32 %v649_v2, %v560_v1  ;;  %v562_v5 = vld [vmem:[#allocation3 + $0x18] sm:$0xf0]  ;;  %v552_v6 = vld [vmem:[#allocation3] sm:$0xf] }
   0xa   :  { %v647_v7 = vld [vmem:[#allocation3 + $0x4] sm:$0xf0]  ;;  %v565_v8 = vor.u32 %v648_v3, %v562_v5  ;;  %v646_v9 = vld [vmem:[#allocation3 + $0x4] sm:$0xf]  ;;  %v554_v10 = vld [vmem:[#allocation3 + $0x8] sm:$0xf0] }
   0xb   :  { %130 = vmatpush.bf16.msra.mxu0 %v561_v4  ;;  %v553_v11 = vor.u32 %v647_v7, %v552_v6  ;;  %v45_v12 = vld [vmem:[%s944_s0] sm:$0xff]  ;;  %v46_v13 = vld [vmem:[%s944_s0 + $0x8] sm:$0xff]  ;;  %v557_v14 = vor.u32 %v646_v9, %v554_v10  ;;  %vm99_vm0 = vcmask 261120   ;;  %v47_v16 = vld [vmem:[%s944_s0 + $0x10] sm:$0xff] }
   0xc   :  { %179 = vmatpush.bf16.msra.mxu1 %v565_v8  ;;  %v61_v15 = vpack.c.bf16 %v46_v13, %v45_v12  ;;  %v48_v17 = vld [vmem:[%s944_s0 + $0x18] sm:$0xff]  ;;  %v49_v19 = vld [vmem:[%s944_s0 + $0x20] sm:$0xff]  ;;  %v50_v20 = vld [vmem:[%s944_s0 + $0x28] sm:$0xff] }
   0xd   :  { %v62_v18 = vpack.c.bf16 %v48_v17, %v47_v16  ;;  %v63_v21 = vpack.c.bf16 %v50_v20, %v49_v19  ;;  %v51_v22 = vld [vmem:[%s944_s0 + $0x30] sm:$0xff]  ;;  %v52_v23 = vld [vmem:[%s944_s0 + $0x38] sm:$0xff]  ;;  %v53_v25 = vld [vmem:[%s944_s0 + $0x40] sm:$0xff] }
   0xe   :  { %v64_v24 = vpack.c.bf16 %v52_v23, %v51_v22  ;;  %v54_v26 = vld [vmem:[%s944_s0 + $0x48] sm:$0xff]  ;;  %v657_v28 = vld [vmem:[%s947_s3 + $0x38] sm:$0xff]  ;;  %v55_v30 = vld [vmem:[%s944_s0 + $0x50] sm:$0xff] }
   0xf   :  { %131 = vmatpush.bf16.msra.mxu0 %v553_v11  ;;  %v65_v27 = vpack.c.bf16 %v54_v26, %v53_v25  ;;  %v665_v29 = vld [vmem:[%s947_s3 + $0x78] sm:$0xff]  ;;  %402 = vmatpush.bf16.msra.mxu2 %v657_v28  ;;  %v656_v33 = vld [vmem:[%s947_s3 + $0x30] sm:$0xff]  ;;  %v655_v35 = vld [vmem:[%s947_s3 + $0x28] sm:$0xff] }
  0x10   :  { %180 = vmatpush.bf16.msra.mxu1 %v557_v14  ;;  %451 = vmatpush.bf16.msra.mxu3 %v665_v29  ;;  %v56_v31 = vld [vmem:[%s944_s0 + $0x58] sm:$0xff]  ;;  %v664_v34 = vld [vmem:[%s947_s3 + $0x70] sm:$0xff]  ;;  %v663_v36 = vld [vmem:[%s947_s3 + $0x68] sm:$0xff] }
  0x11   :  { %v66_v32 = vpack.c.bf16 %v56_v31, %v55_v30  ;;  %v654_v37 = vld [vmem:[%s947_s3 + $0x20] sm:$0xff]  ;;  %v58_v40 = vld [vmem:[%s944_s0 + $0x68] sm:$0xff]  ;;  %v653_v42 = vld [vmem:[%s947_s3 + $0x18] sm:$0xff] }
  0x12   :  { %566 = vmatmul.msk.bf16.vlgmr.msra.gmra.mxu0 %vm99_vm0, %v61_v15  ;;  %v662_v38 = vld [vmem:[%s947_s3 + $0x60] sm:$0xff]  ;;  %v661_v43 = vld [vmem:[%s947_s3 + $0x58] sm:$0xff]  ;;  %v652_v44 = vld [vmem:[%s947_s3 + $0x10] sm:$0xff] }
  0x13   :  { %574 = vmatmul.msk.bf16.vlgmr.msra.gmra.mxu1 %vm99_vm0, %v61_v15  ;;  %403 = vmatpush.bf16.msra.mxu2 %v656_v33  ;;  %v57_v39 = vld [vmem:[%s944_s0 + $0x60] sm:$0xff]  ;;  %v660_v45 = vld [vmem:[%s947_s3 + $0x50] sm:$0xff]  ;;  %v651_v46 = vld [vmem:[%s947_s3 + $0x8] sm:$0xff] }
  0x14   :  { %452 = vmatpush.bf16.msra.mxu3 %v664_v34  ;;  %v67_v41 = vpack.c.bf16 %v58_v40, %v57_v39  ;;  %v659_v47 = vld [vmem:[%s947_s3 + $0x48] sm:$0xff]  ;;  %v650_v48 = vld [vmem:[%s947_s3] sm:$0xff]  ;;  %v59_v50 = vld [vmem:[%s944_s0 + $0x70] sm:$0xff] }
  0x15   :  { %v658_v49 = vld [vmem:[%s947_s3 + $0x40] sm:$0xff]  ;;  %v60_v51 = vld [vmem:[%s944_s0 + $0x78] sm:$0xff] }
  0x16   :  { %v68_v52 = vpack.c.bf16 %v60_v51, %v59_v50  ;;  %v73_v53 = vld [vmem:[%s946_s2] sm:$0x3] }
  0x17   :  { %404 = vmatpush.bf16.msra.mxu2 %v655_v35  ;;  %v863_v56 = vperm.slane %v73_v53, 0  ;;  %v865_v57 = vperm.slane %v73_v53, 1 }
  0x18   :  { %453 = vmatpush.bf16.msra.mxu3 %v663_v36 }
  0x1b   :  { %405 = vmatpush.bf16.msra.mxu2 %v654_v37 }
  0x1c   :  { %454 = vmatpush.bf16.msra.mxu3 %v662_v38 }
  0x1f   :  { %406 = vmatpush.bf16.msra.mxu2 %v653_v42 }
  0x20   :  { %455 = vmatpush.bf16.msra.mxu3 %v661_v43 }
  0x22   :  { %567 = vmatmul.msk.bf16.gmra.mxu0 %vm99_vm0, %v62_v18 }
  0x23   :  { %575 = vmatmul.msk.bf16.gmra.mxu1 %vm99_vm0, %v62_v18  ;;  %407 = vmatpush.bf16.msra.mxu2 %v652_v44 }
  0x24   :  { %456 = vmatpush.bf16.msra.mxu3 %v660_v45 }
  0x27   :  { %408 = vmatpush.bf16.msra.mxu2 %v651_v46 }
  0x28   :  { %457 = vmatpush.bf16.msra.mxu3 %v659_v47 }
  0x2b   :  { %409 = vmatpush.bf16.msra.mxu2 %v650_v48 }
  0x2c   :  { %458 = vmatpush.bf16.msra.mxu3 %v658_v49 }
  0x32   :  { %568 = vmatmul.msk.bf16.gmra.mxu0 %vm99_vm0, %v63_v21 }
  0x33   :  { %576 = vmatmul.msk.bf16.gmra.mxu1 %vm99_vm0, %v63_v21 }
  0x42   :  { %569 = vmatmul.msk.bf16.gmra.mxu0 %vm99_vm0, %v64_v24 }
  0x43   :  { %577 = vmatmul.msk.bf16.gmra.mxu1 %vm99_vm0, %v64_v24 }
  0x52   :  { %570 = vmatmul.msk.bf16.gmra.mxu0 %vm99_vm0, %v65_v27 }
  0x53   :  { %578 = vmatmul.msk.bf16.gmra.mxu1 %vm99_vm0, %v65_v27 }
  0x62   :  { %571 = vmatmul.msk.bf16.gmra.mxu0 %vm99_vm0, %v66_v32 }
  0x63   :  { %579 = vmatmul.msk.bf16.gmra.mxu1 %vm99_vm0, %v66_v32 }
  0x72   :  { %572 = vmatmul.msk.bf16.gmra.mxu0 %vm99_vm0, %v67_v41 }
  0x73   :  { %580 = vmatmul.msk.bf16.gmra.mxu1 %vm99_vm0, %v67_v41 }
  0x82   :  { %573 = vmatmul.msk.bf16.gmra.mxu0 %vm99_vm0, %v68_v52 }
  0x83   :  { %581 = vmatmul.msk.bf16.gmra.mxu1 %vm99_vm0, %v68_v52 }
  0x8f   :  { %v133_v54 = vpop.f32.mrf.mxu0 }
  0x90   :  { %v182_v55 = vpop.f32.mrf.mxu1  ;;  %v134_v58 = vadd.f32 %v133_v54, %v863_v56 }
  0x91   :  { %v183_v59 = vadd.f32 %v182_v55, %v865_v57 }
  0x92   :  { %v222_v0 = vmax.f32 %v134_v58, 0.0 }
  0x93   :  { %v223_v2 = vmax.f32 %v183_v59, 0.0 }
  0x97   :  { %v135_v60 = vpop.f32.mrf.mxu0 }
  0x98   :  { %v136_v61 = vadd.f32 %v135_v60, %v863_v56  ;;  %v184_v62 = vpop.f32.mrf.mxu1 }
  0x99   :  { %v185_v63 = vadd.f32 %v184_v62, %v865_v57 }
  0x9a   :  { %v224_v1 = vmax.f32 %v136_v61, 0.0 }
  0x9b   :  { %v225_v3 = vmax.f32 %v185_v63, 0.0 }
  0x9c   :  { %v254_v4 = vpack.c.bf16 %v224_v1, %v222_v0 }
  0x9d   :  { %v255_v5 = vpack.c.bf16 %v225_v3, %v223_v2 }
  0x9e   :  { %410 = vmatmul.bf16.vlgmr.msra.gmra.mxu2 %v254_v4 }
  0x9f   :  { %459 = vmatmul.bf16.vlgmr.msra.gmra.mxu3 %v255_v5  ;;  %v138_v6 = vpop.f32.mrf.mxu0 }
  0xa0   :  { %v187_v7 = vpop.f32.mrf.mxu1  ;;  %v139_v8 = vadd.f32 %v138_v6, %v863_v56 }
  0xa1   :  { %v188_v9 = vadd.f32 %v187_v7, %v865_v57 }
  0xa2   :  { %v226_v14 = vmax.f32 %v139_v8, 0.0 }
  0xa3   :  { %v227_v16 = vmax.f32 %v188_v9, 0.0 }
  0xa7   :  { %v140_v10 = vpop.f32.mrf.mxu0 }
  0xa8   :  { %v141_v11 = vadd.f32 %v140_v10, %v863_v56  ;;  %v189_v12 = vpop.f32.mrf.mxu1 }
  0xa9   :  { %v190_v13 = vadd.f32 %v189_v12, %v865_v57 }
  0xaa   :  { %v228_v15 = vmax.f32 %v141_v11, 0.0 }
  0xab   :  { %v229_v17 = vmax.f32 %v190_v13, 0.0 }
  0xac   :  { %v256_v18 = vpack.c.bf16 %v228_v15, %v226_v14 }
  0xad   :  { %v257_v19 = vpack.c.bf16 %v229_v17, %v227_v16 }
  0xae   :  { %415 = vmatmul.bf16.gmra.mxu2 %v256_v18 }
  0xaf   :  { %464 = vmatmul.bf16.gmra.mxu3 %v257_v19  ;;  %v143_v20 = vpop.f32.mrf.mxu0 }
  0xb0   :  { %v192_v21 = vpop.f32.mrf.mxu1  ;;  %v144_v22 = vadd.f32 %v143_v20, %v863_v56 }
  0xb1   :  { %v193_v23 = vadd.f32 %v192_v21, %v865_v57 }
  0xb2   :  { %v230_v28 = vmax.f32 %v144_v22, 0.0 }
  0xb3   :  { %v231_v30 = vmax.f32 %v193_v23, 0.0 }
  0xb7   :  { %v145_v24 = vpop.f32.mrf.mxu0 }
  0xb8   :  { %v146_v25 = vadd.f32 %v145_v24, %v863_v56  ;;  %v194_v26 = vpop.f32.mrf.mxu1 }
  0xb9   :  { %v195_v27 = vadd.f32 %v194_v26, %v865_v57 }
  0xba   :  { %v232_v29 = vmax.f32 %v146_v25, 0.0 }
  0xbb   :  { %v233_v31 = vmax.f32 %v195_v27, 0.0 }
  0xbc   :  { %v258_v32 = vpack.c.bf16 %v232_v29, %v230_v28 }
  0xbd   :  { %v259_v33 = vpack.c.bf16 %v233_v31, %v231_v30 }
  0xbe   :  { %420 = vmatmul.bf16.gmra.mxu2 %v258_v32 }
  0xbf   :  { %469 = vmatmul.bf16.gmra.mxu3 %v259_v33  ;;  %v148_v34 = vpop.f32.mrf.mxu0 }
  0xc0   :  { %v197_v35 = vpop.f32.mrf.mxu1  ;;  %v149_v36 = vadd.f32 %v148_v34, %v863_v56 }
  0xc1   :  { %v198_v37 = vadd.f32 %v197_v35, %v865_v57 }
  0xc2   :  { %v234_v42 = vmax.f32 %v149_v36, 0.0 }
  0xc3   :  { %v235_v44 = vmax.f32 %v198_v37, 0.0 }
  0xc7   :  { %v150_v38 = vpop.f32.mrf.mxu0 }
  0xc8   :  { %v151_v39 = vadd.f32 %v150_v38, %v863_v56  ;;  %v199_v40 = vpop.f32.mrf.mxu1 }
  0xc9   :  { %v200_v41 = vadd.f32 %v199_v40, %v865_v57 }
  0xca   :  { %v236_v43 = vmax.f32 %v151_v39, 0.0 }
  0xcb   :  { %v237_v45 = vmax.f32 %v200_v41, 0.0 }
  0xcc   :  { %v260_v46 = vpack.c.bf16 %v236_v43, %v234_v42  ;;  %v902_v42 = vld [vmem:[%s948_s4] ss:$0 sm:$0xff] }
  0xcd   :  { %v261_v47 = vpack.c.bf16 %v237_v45, %v235_v44 }
  0xce   :  { %425 = vmatmul.bf16.gmra.mxu2 %v260_v46 }
  0xcf   :  { %474 = vmatmul.bf16.gmra.mxu3 %v261_v47  ;;  %v153_v48 = vpop.f32.mrf.mxu0 }
  0xd0   :  { %v202_v49 = vpop.f32.mrf.mxu1  ;;  %v154_v50 = vadd.f32 %v153_v48, %v863_v56 }
  0xd1   :  { %v203_v51 = vadd.f32 %v202_v49, %v865_v57 }
  0xd2   :  { %v238_v58 = vmax.f32 %v154_v50, 0.0 }
  0xd3   :  { %v239_v60 = vmax.f32 %v203_v51, 0.0 }
  0xd7   :  { %v155_v52 = vpop.f32.mrf.mxu0 }
  0xd8   :  { %v156_v53 = vadd.f32 %v155_v52, %v863_v56  ;;  %v204_v54 = vpop.f32.mrf.mxu1 }
  0xd9   :  { %v205_v55 = vadd.f32 %v204_v54, %v865_v57 }
  0xda   :  { %v240_v59 = vmax.f32 %v156_v53, 0.0 }
  0xdb   :  { %v241_v61 = vmax.f32 %v205_v55, 0.0 }
  0xdc   :  { %v262_v62 = vpack.c.bf16 %v240_v59, %v238_v58 }
  0xdd   :  { %v263_v63 = vpack.c.bf16 %v241_v61, %v239_v60 }
  0xde   :  { %430 = vmatmul.bf16.gmra.mxu2 %v262_v62 }
  0xdf   :  { %479 = vmatmul.bf16.gmra.mxu3 %v263_v63  ;;  %v158_v0 = vpop.f32.mrf.mxu0 }
  0xe0   :  { %v207_v1 = vpop.f32.mrf.mxu1  ;;  %v159_v2 = vadd.f32 %v158_v0, %v863_v56 }
  0xe1   :  { %v208_v3 = vadd.f32 %v207_v1, %v865_v57 }
  0xe2   :  { %v242_v8 = vmax.f32 %v159_v2, 0.0 }
  0xe3   :  { %v243_v10 = vmax.f32 %v208_v3, 0.0 }
  0xe7   :  { %v160_v4 = vpop.f32.mrf.mxu0 }
  0xe8   :  { %v161_v5 = vadd.f32 %v160_v4, %v863_v56  ;;  %v209_v6 = vpop.f32.mrf.mxu1 }
  0xe9   :  { %v210_v7 = vadd.f32 %v209_v6, %v865_v57 }
  0xea   :  { %v244_v9 = vmax.f32 %v161_v5, 0.0 }
  0xeb   :  { %v245_v11 = vmax.f32 %v210_v7, 0.0 }
  0xec   :  { %v264_v12 = vpack.c.bf16 %v244_v9, %v242_v8 }
  0xed   :  { %v265_v13 = vpack.c.bf16 %v245_v11, %v243_v10 }
  0xee   :  { %435 = vmatmul.bf16.gmra.mxu2 %v264_v12 }
  0xef   :  { %484 = vmatmul.bf16.gmra.mxu3 %v265_v13  ;;  %v163_v14 = vpop.f32.mrf.mxu0 }
  0xf0   :  { %v212_v15 = vpop.f32.mrf.mxu1  ;;  %v164_v16 = vadd.f32 %v163_v14, %v863_v56 }
  0xf1   :  { %v213_v17 = vadd.f32 %v212_v15, %v865_v57 }
  0xf2   :  { %v246_v22 = vmax.f32 %v164_v16, 0.0 }
  0xf3   :  { %v247_v24 = vmax.f32 %v213_v17, 0.0 }
  0xf7   :  { %v165_v18 = vpop.f32.mrf.mxu0 }
  0xf8   :  { %v166_v19 = vadd.f32 %v165_v18, %v863_v56  ;;  %v214_v20 = vpop.f32.mrf.mxu1 }
  0xf9   :  { %v215_v21 = vadd.f32 %v214_v20, %v865_v57 }
  0xfa   :  { %v248_v23 = vmax.f32 %v166_v19, 0.0 }
  0xfb   :  { %v249_v25 = vmax.f32 %v215_v21, 0.0 }
  0xfc   :  { %v266_v26 = vpack.c.bf16 %v248_v23, %v246_v22 }
  0xfd   :  { %v267_v27 = vpack.c.bf16 %v249_v25, %v247_v24 }
  0xfe   :  { %440 = vmatmul.bf16.gmra.mxu2 %v266_v26 }
  0xff   :  { %489 = vmatmul.bf16.gmra.mxu3 %v267_v27  ;;  %v168_v28 = vpop.f32.mrf.mxu0 }
 0x100   :  { %v217_v29 = vpop.f32.mrf.mxu1  ;;  %v169_v30 = vadd.f32 %v168_v28, %v863_v56 }
 0x101   :  { %v218_v31 = vadd.f32 %v217_v29, %v865_v57 }
 0x102   :  { %v250_v36 = vmax.f32 %v169_v30, 0.0 }
 0x103   :  { %v251_v38 = vmax.f32 %v218_v31, 0.0 }
 0x107   :  { %v170_v32 = vpop.f32.mrf.mxu0 }
 0x108   :  { %v171_v33 = vadd.f32 %v170_v32, %v863_v56  ;;  %v219_v34 = vpop.f32.mrf.mxu1 }
 0x109   :  { %v220_v35 = vadd.f32 %v219_v34, %v865_v57 }
 0x10a   :  { %v252_v37 = vmax.f32 %v171_v33, 0.0 }
 0x10b   :  { %v253_v39 = vmax.f32 %v220_v35, 0.0 }
 0x10c   :  { %v268_v40 = vpack.c.bf16 %v252_v37, %v250_v36 }
 0x10d   :  { %v269_v41 = vpack.c.bf16 %v253_v39, %v251_v38 }
 0x10e   :  { %445 = vmatmul.bf16.gmra.mxu2 %v268_v40 }
 0x10f   :  { %494 = vmatmul.bf16.gmra.mxu3 %v269_v41 }
 0x121   :  { %v411_v43 = vpop.f32.mrf.mxu2 }
 0x122   :  { %v412_v44 = vadd.f32 %v902_v42, %v411_v43  ;;  %v460_v56 = vpop.f32.mrf.mxu3 }
 0x124   :  { %v905_v45 = vadd.f32 %v460_v56, %v412_v44 }
 0x129   :  { %v413_v57 = vpop.f32.mrf.mxu2 }
 0x12a   :  { %v414_v46 = vadd.f32 %v902_v42, %v413_v57  ;;  %v462_v47 = vpop.f32.mrf.mxu3 }
 0x12c   :  { %v908_v48 = vadd.f32 %v462_v47, %v414_v46 }
 0x131   :  { %v416_v49 = vpop.f32.mrf.mxu2 }
 0x132   :  { %v417_v50 = vadd.f32 %v902_v42, %v416_v49  ;;  %v465_v51 = vpop.f32.mrf.mxu3 }
 0x134   :  { %v911_v52 = vadd.f32 %v465_v51, %v417_v50 }
 0x139   :  { %v418_v53 = vpop.f32.mrf.mxu2 }
 0x13a   :  { %v419_v54 = vadd.f32 %v902_v42, %v418_v53  ;;  %v467_v55 = vpop.f32.mrf.mxu3 }
 0x13c   :  { %v914_v58 = vadd.f32 %v467_v55, %v419_v54  ;;  %v517_v54 = vld [vmem:[#allocation2] sm:$0x1]  ;;  %v701_v55 = vmov 0  }
 0x13d   :  { %670 = vset.pattern.permute.xlu0 %v701_v55 }
 0x13e   :  { %520 = vperm.xlu0 %670, %v517_v54  }
 0x141   :  { %v421_v59 = vpop.f32.mrf.mxu2 }
 0x142   :  { %v422_v60 = vadd.f32 %v902_v42, %v421_v59  ;;  %v470_v61 = vpop.f32.mrf.mxu3 }
 0x144   :  { %v917_v62 = vadd.f32 %v470_v61, %v422_v60  ;;  %v503_v61 = vmax.f32 %v914_v58, 0.0 }
 0x146   :  { %v504_v60 = vmax.f32 %v917_v62, 0.0 }
 0x149   :  { %v423_v63 = vpop.f32.mrf.mxu2 }
 0x14a   :  { %v424_v0 = vadd.f32 %v902_v42, %v423_v63  ;;  %v472_v1 = vpop.f32.mrf.mxu3  ;;  %v502_v63 = vmax.f32 %v911_v52, 0.0 }
 0x14c   :  { %v920_v2 = vadd.f32 %v472_v1, %v424_v0  ;;  %v501_v0 = vmax.f32 %v908_v48, 0.0  ;;  %v500_v1 = vmax.f32 %v905_v45, 0.0 }
 0x151   :  { %v426_v3 = vpop.f32.mrf.mxu2 }
 0x152   :  { %v427_v4 = vadd.f32 %v902_v42, %v426_v3  ;;  %v475_v5 = vpop.f32.mrf.mxu3 }
 0x154   :  { %v476_v6 = vadd.f32 %v475_v5, %v427_v4 }
 0x156   :  { %v506_v59 = vmax.f32 %v476_v6, 0.0 }
 0x159   :  { %v428_v7 = vpop.f32.mrf.mxu2 }
 0x15a   :  { %v429_v8 = vadd.f32 %v902_v42, %v428_v7  ;;  %v477_v9 = vpop.f32.mrf.mxu3 }
 0x15c   :  { %v478_v10 = vadd.f32 %v477_v9, %v429_v8 }
 0x15e   :  { %v507_v53 = vmax.f32 %v478_v10, 0.0 }
 0x161   :  { %v431_v11 = vpop.f32.mrf.mxu2 }
 0x162   :  { %v432_v12 = vadd.f32 %v902_v42, %v431_v11  ;;  %v480_v13 = vpop.f32.mrf.mxu3 }
 0x164   :  { %v481_v14 = vadd.f32 %v480_v13, %v432_v12 }
 0x166   :  { %v508_v51 = vmax.f32 %v481_v14, 0.0 }
 0x169   :  { %v433_v15 = vpop.f32.mrf.mxu2 }
 0x16a   :  { %v434_v16 = vadd.f32 %v902_v42, %v433_v15  ;;  %v482_v17 = vpop.f32.mrf.mxu3 }
 0x16c   :  { %v483_v18 = vadd.f32 %v482_v17, %v434_v16 }
 0x16e   :  { %v509_v50 = vmax.f32 %v483_v18, 0.0 }
 0x171   :  { %v436_v19 = vpop.f32.mrf.mxu2 }
 0x172   :  { %v485_v20 = vpop.f32.mrf.mxu3  ;;  %v437_v44 = vadd.f32 %v902_v42, %v436_v19 }
 0x174   :  { %v486_v46 = vadd.f32 %v485_v20, %v437_v44 }
 0x176   :  { %v510_v49 = vmax.f32 %v486_v46, 0.0 }
 0x179   :  { %v438_v21 = vpop.f32.mrf.mxu2 }
 0x17a   :  { %v487_v22 = vpop.f32.mrf.mxu3  ;;  %v439_v40 = vadd.f32 %v902_v42, %v438_v21 }
 0x17c   :  { %v488_v56 = vadd.f32 %v487_v22, %v439_v40 }
 0x17e   :  { %v511_v47 = vmax.f32 %v488_v56, 0.0 }
 0x181   :  { %v441_v23 = vpop.f32.mrf.mxu2 }
 0x182   :  { %v490_v24 = vpop.f32.mrf.mxu3  ;;  %v442_v37 = vadd.f32 %v902_v42, %v441_v23 }
 0x184   :  { %v491_v41 = vadd.f32 %v490_v24, %v442_v37 }
 0x186   :  { %v512_v57 = vmax.f32 %v491_v41, 0.0 }
 0x189   :  { %v443_v25 = vpop.f32.mrf.mxu2 }
 0x18a   :  { %v492_v26 = vpop.f32.mrf.mxu3  ;;  %v444_v34 = vadd.f32 %v902_v42, %v443_v25 }
 0x18c   :  { %v493_v38 = vadd.f32 %v492_v26, %v444_v34 }
 0x18e   :  { %v513_v43 = vmax.f32 %v493_v38, 0.0 }
 0x191   :  { %v446_v27 = vpop.f32.mrf.mxu2 }
 0x192   :  { %v495_v28 = vpop.f32.mrf.mxu3  ;;  %v447_v30 = vadd.f32 %v902_v42, %v446_v27 }
 0x194   :  { %v496_v35 = vadd.f32 %v495_v28, %v447_v30 }
 0x196   :  { %v514_v39 = vmax.f32 %v496_v35, 0.0 }
 0x199   :  { %v448_v29 = vpop.f32.mrf.mxu2 }
 0x19a   :  { %v449_v31 = vadd.f32 %v902_v42, %v448_v29  ;;  %v497_v32 = vpop.f32.mrf.mxu3  ;;  %v505_v42 = vmax.f32 %v920_v2, 0.0  ;;  %v516_v2 = vld [vmem:[%s949_s5] sm:$0x1] }
 0x19c   :  { %v498_v33 = vadd.f32 %v497_v32, %v449_v31 }
 0x19e   :  { %v515_v36 = vmax.f32 %v498_v33, 0.0 }
 0x1a0   :  { %524 = vmatpush.xpose.msrb.mxu0 %v515_v36 }
 0x1a4   :  { %525 = vmatpush.xpose.msrb.mxu0 %v514_v39 }
 0x1a8   :  { %526 = vmatpush.xpose.msrb.mxu0 %v513_v43 }
 0x1ac   :  { %527 = vmatpush.xpose.msrb.mxu0 %v512_v57 }
 0x1b0   :  { %528 = vmatpush.xpose.msrb.mxu0 %v511_v47  ;;  %v521_v3 = vpop.permute.xlu0 %520 }
 0x1b1   :  { %v523_v62 = vperm.slane %v521_v3, 0 }
 0x1b4   :  { %529 = vmatpush.xpose.msrb.mxu0 %v510_v49 }
 0x1b8   :  { %530 = vmatpush.xpose.msrb.mxu0 %v509_v50 }
 0x1bc   :  { %531 = vmatpush.xpose.msrb.mxu0 %v508_v51 }
 0x1c0   :  { %532 = vmatpush.xpose.msrb.mxu0 %v507_v53 }
 0x1c4   :  { %533 = vmatpush.xpose.msrb.mxu0 %v506_v59 }
 0x1c8   :  { %534 = vmatpush.xpose.msrb.mxu0 %v505_v42 }
 0x1cc   :  { %535 = vmatpush.xpose.msrb.mxu0 %v504_v60 }
 0x1d0   :  { %536 = vmatpush.xpose.msrb.mxu0 %v503_v61 }
 0x1d4   :  { %537 = vmatpush.xpose.msrb.mxu0 %v502_v63 }
 0x1d8   :  { %538 = vmatpush.xpose.msrb.mxu0 %v501_v0 }
 0x1dc   :  { %539 = vmatpush.xpose.msrb.mxu0 %v500_v1 }
 0x1df   :  { %540 = vmatmul.f32.vlgmr.msrb.gmra.mxu0 %v516_v2 }
 0x25c   :  { %v541_v4 = vpop.f32.mrf.mxu0 }
 0x25d   :  { %v542_v5 = vadd.f32 %v541_v4, %v523_v62 }
 0x25f   :  { %544 = vst [vmem:[%s951_s7] sm:$0x1] %v542_v5 }
 0x260   :  { %549 = vsyncpa [#allocation4], 1 }

</bundles_post_ra>
